<compile_context>
chip_gen: v5e
topology: v5e:2x2
jax: 0.10.0
libtpu: 0.0.40
codegen_flags: <defaults>
</compile_context>

<pallas_src>
import functools
import math

import jax
import jax.numpy as jnp
from jax import lax
from jax.experimental import pallas as pl
from jax.experimental.pallas import tpu as pltpu

LEAKY_SLOPE = 0.2
BN_EPS = 1e-5
_PAD = 8  # sublane-aligned offset of the real rows inside the conv2 scratch


# ------------------------------ fused kernel --------------------------------
def _film_block_kernel(*refs, bt, l1, use_ada):
    if use_ada:
        film_ref, p1_ref, w1_ref, b1_ref, w2_ref, b2_ref, o_ref, pad_ref = refs
    else:
        p1_ref, w1_ref, b1_ref, w2_ref, b2_ref, o_ref, pad_ref = refs

    rows = bt * l1
    mxu = w2_ref.dtype

    # ---- conv1 (single im2col MXU matmul over all Bt*L1 rows) + BN1 + LeakyReLU ----
    h1 = jnp.dot(p1_ref[...], w1_ref[...], preferred_element_type=jnp.float32)
    h1 = h1 + b1_ref[...]                                  # folded BN1 bias
    h1 = jnp.where(h1 >= 0.0, h1, LEAKY_SLOPE * h1)        # (rows, C) f32 == identity

    # ---- conv2 (k=3, p=1) as 3 shifted MXU dots ----
    # Write h1 once at a sublane-aligned offset; +-1 taps are shifted reads of the
    # same ref.  The scratch is NEVER zero-filled: halo rows (never written) and
    # intra-tile batch-boundary rows are masked to 0 before the dot, which is what
    # conv padding requires anyway.
    pad_ref[_PAD:_PAD + rows, :] = h1
    rid = lax.broadcasted_iota(jnp.int32, (rows, 1), 0)
    pos = (rid % l1) if bt > 1 else rid
    first_row = pos == 0
    last_row = pos == (l1 - 1)

    h1_c = h1.astype(mxu)
    h1_p = jnp.where(first_row, 0.0,
                     pad_ref[_PAD - 1:_PAD - 1 + rows, :]).astype(mxu)   # h1[t-1]
    h1_n = jnp.where(last_row, 0.0,
                     pad_ref[_PAD + 1:_PAD + 1 + rows, :]).astype(mxu)   # h1[t+1]

    y = jnp.dot(h1_p, w2_ref[0], preferred_element_type=jnp.float32)
    y = y + jnp.dot(h1_c, w2_ref[1], preferred_element_type=jnp.float32)
    y = y + jnp.dot(h1_n, w2_ref[2], preferred_element_type=jnp.float32)
    y = y + b2_ref[...]                                    # folded BN2 bias

    # ---- FiLM:  (1-g)*y + g*(shift + y*(scale+1))  ==  y*(1+g*scale) + g*shift ----
    # Per-batch scalars live in SMEM (scalar prefetch); build per-row columns with a
    # short static where-chain (one entry per batch segment in this tile).
    if use_ada:
        b0 = pl.program_id(0) * bt
        a_col = jnp.full((rows, 1), film_ref[b0, 0], jnp.float32)
        s_col = jnp.full((rows, 1), film_ref[b0, 1], jnp.float32)
        for bb in range(1, bt):
            in_seg = rid >= bb * l1
            a_col = jnp.where(in_seg, film_ref[b0 + bb, 0], a_col)
            s_col = jnp.where(in_seg, film_ref[b0 + bb, 1], s_col)
        y = y * a_col + s_col

    # ---- LeakyReLU + residual ----
    y = jnp.where(y >= 0.0, y, LEAKY_SLOPE * y)
    o_ref[...] = (h1 + y).astype(o_ref.dtype)


# --------------------------- batch-tile selection ----------------------------
def _pick_block_batch(B, L1, max_rows=256):
    """Largest divisor Bt of B with sublane-aligned Bt*L1 rows, rows<=~256, and
    >=2 grid steps kept when possible (megacore / 2-TC chips)."""
    candidates = []
    for bt in range(1, B + 1):
        if B % bt:
            continue
        if bt < B and (bt * L1) % 8 != 0:     # partial blocks must be sublane-aligned
            continue
        candidates.append(bt)

    def score(bt):
        steps = B // bt
        rows = bt * L1
        return ((steps >= 2) or (B < 2), rows <= max(max_rows, L1), bt)

    return max(candidates, key=score)


# ------------------------------- wrapper -------------------------------------
def film_block_forward(params, x, sigma_emb=None, *, use_ada=False,
                       mxu_dtype=jnp.bfloat16, channels_last=True):
    """x: (B, C_in, L) NCL like the PyTorch module.

    Returns (B, L_out, C_out) channels-last by default (no output transpose);
    channels_last=False returns PyTorch-style (B, C_out, L_out).
    """
    B, C_in, L = x.shape
    w1, w2 = params["w1"], params["w2"]
    C_out = w1.shape[0]
    K1, S1, P1, K2 = 4, 4, 1, 3
    L1 = (L + 2 * P1 - K1) // S1 + 1

    # conv1 im2col is a free reshape because kernel == stride:
    #   patches[b*L1 + t, k*C_in + c] = x_padded[b, c, S1*t + k]
    x_cl = jnp.transpose(x, (0, 2, 1)).astype(jnp.float32)            # (B, L, C_in)
    x_p = jnp.pad(x_cl, ((0, 0), (P1, P1), (0, 0)))[:, :S1 * L1, :]
    patches = x_p.reshape(B * L1, K1 * C_in).astype(mxu_dtype)

    # Fold eval-mode BN scale into the conv weights (pre-cast to MXU dtype wrapper
    # side); only an f32 bias row per conv is added in-kernel.
    g1, be1, m1, v1 = params["bn1"]
    g2, be2, m2, v2 = params["bn2"]
    s1 = g1 / jnp.sqrt(v1 + BN_EPS)
    s2 = g2 / jnp.sqrt(v2 + BN_EPS)
    w1_2d = (jnp.transpose(w1, (2, 1, 0)).reshape(K1 * C_in, C_out)
             * s1[None, :]).astype(mxu_dtype)
    w2_t = (jnp.transpose(w2, (2, 1, 0)) * s2[None, None, :]).astype(mxu_dtype)
    b1 = (be1 - m1 * s1).reshape(1, C_out).astype(jnp.float32)
    b2 = (be2 - m2 * s2).reshape(1, C_out).astype(jnp.float32)

    Bt = _pick_block_batch(B, L1)
    rows = Bt * L1
    grid = (B // Bt,)

    if use_ada:
        idx_rows = lambda i, film: (i, 0)
        idx_w2 = lambda i, film: (0, 0, 0)
        idx_full = lambda i, film: (0, 0)
    else:
        idx_rows = lambda i: (i, 0)
        idx_w2 = lambda i: (0, 0, 0)
        idx_full = lambda i: (0, 0)

    in_specs = [
        pl.BlockSpec((rows, K1 * C_in), idx_rows),
        pl.BlockSpec((K1 * C_in, C_out), idx_full),
        pl.BlockSpec((1, C_out), idx_full),
        pl.BlockSpec((K2, C_out, C_out), idx_w2),
        pl.BlockSpec((1, C_out), idx_full),
    ]
    args = [patches, w1_2d, b1, w2_t, b2]
    num_sp = 0
    if use_ada:
        # AdaLNZero modulation (SiLU + tiny Linear -> 3 scalars / batch) in plain JAX;
        # collapsed to a per-batch affine (a, b) = (1 + g*scale, g*shift) -> SMEM.
        mod = jax.nn.silu(sigma_emb.astype(jnp.float32)) @ params["wm"].T + params["bm"]
        c_shift, c_scale, c_gate = mod[:, 0], mod[:, 1], mod[:, 2]
        film = jnp.stack([1.0 + c_gate * c_scale, c_gate * c_shift],
                         axis=-1).astype(jnp.float32)                 # (B, 2)
        args = [film] + args
        num_sp = 1

    # Per-step VMEM estimate (double-buffered blocks + weights + scratch).
    itemsize = jnp.dtype(mxu_dtype).itemsize
    est = (2 * rows * K1 * C_in * itemsize            # patches block x2
           + 2 * rows * C_out * 4                     # output block x2
           + 2 * (K1 * C_in + K2 * C_out) * C_out * itemsize
           + (rows + 2 * _PAD) * C_out * 4
           + 4 * C_out * 4)
    vmem_limit = int(min(100 * 2 ** 20, max(32 * 2 ** 20, 4 * est)))

    out_flat = pl.pallas_call(
        functools.partial(_film_block_kernel, bt=Bt, l1=L1, use_ada=use_ada),
        out_shape=jax.ShapeDtypeStruct((B * L1, C_out), jnp.float32),
        grid_spec=pltpu.PrefetchScalarGridSpec(
            num_scalar_prefetch=num_sp,
            grid=grid,
            in_specs=in_specs,
            out_specs=pl.BlockSpec((rows, C_out), idx_rows),
            scratch_shapes=[pltpu.VMEM((rows + 2 * _PAD, C_out), jnp.float32)]),
        compiler_params=pltpu.CompilerParams(
            dimension_semantics=("parallel",),
            vmem_limit_bytes=vmem_limit),
    )(*args)

    out = out_flat.reshape(B, L1, C_out)              # channels-last (B, L1, C_out)
    if channels_last:
        return out
    return jnp.transpose(out, (0, 2, 1))              # PyTorch NCL (B, C_out, L1)


# --------------------------- pure-JAX reference ------------------------------
def _ref_film_block(params, x, sigma_emb=None, *, use_ada=False):
    def conv1d(h, w, stride, pad):
        return lax.conv_general_dilated(
            h, w, (stride,), [(pad, pad)],
            dimension_numbers=("NCH", "OIH", "NCH"),
            precision=lax.Precision.HIGHEST)

    def bn(h, stats):
        g, b, m, v = stats
        return ((h - m[None, :, None]) / jnp.sqrt(v[None, :, None] + BN_EPS)
                * g[None, :, None] + b[None, :, None])

    def lrelu(h):
        return jnp.where(h >= 0.0, h, LEAKY_SLOPE * h)

    h = lrelu(bn(conv1d(x, params["w1"], 4, 1), params["bn1"]))
    identity = h
    y = bn(conv1d(h, params["w2"], 1, 1), params["bn2"])
    if use_ada:
        mod = jax.nn.silu(sigma_emb.astype(jnp.float32)) @ params["wm"].T + params["bm"]
        c_shift = mod[:, 0][:, None, None]
        c_scale = mod[:, 1][:, None, None]
        c_gate = mod[:, 2][:, None, None]
        y = (1.0 - c_gate) * y + c_gate * (c_shift + y * (c_scale + 1.0))
    y = lrelu(y)
    return identity + y


# ------------------------------- parameters ----------------------------------
def init_params(key, in_dim, out_dim, ada_in=512):
    ks = jax.random.split(key, 5)
    w1 = jax.random.normal(ks[0], (out_dim, in_dim, 4), jnp.float32) / math.sqrt(in_dim * 4)
    w2 = jax.random.normal(ks[1], (out_dim, out_dim, 3), jnp.float32) / math.sqrt(out_dim * 3)

    def bn_stats(k):  # non-trivial eval-mode BN running stats to exercise the fold
        kk = jax.random.split(k, 4)
        gamma = 1.0 + 0.1 * jax.random.normal(kk[0], (out_dim,), jnp.float32)
        beta = 0.1 * jax.random.normal(kk[1], (out_dim,), jnp.float32)
        mean = 0.1 * jax.random.normal(kk[2], (out_dim,), jnp.float32)
        var = 0.5 + jnp.abs(jax.random.normal(kk[3], (out_dim,), jnp.float32))
        return (gamma, beta, mean, var)

    wm = 0.02 * jax.random.normal(ks[4], (3, ada_in), jnp.float32)   # AdaLNZero.init_weight
    bm = jnp.zeros((3,), jnp.float32)
    return dict(w1=w1, w2=w2, bn1=bn_stats(ks[2]), bn2=bn_stats(ks[3]), wm=wm, bm=bm)


if __name__ == "__main__":
    B, C_in, C_out, L, ADA_IN = 2, 8, 32, 64, 512
    kp, kx, ksig = jax.random.split(jax.random.PRNGKey(0), 3)
    params = init_params(kp, C_in, C_out, ADA_IN)
    x = jax.random.normal(kx, (B, C_in, L), jnp.float32)
    sigma_emb = jax.random.normal(ksig, (B, ADA_IN), jnp.float32)
    L_out = (L + 2 - 4) // 4 + 1

    # 1) exact-arithmetic path (f32 MXU operands), PyTorch NCL layout: tight check.
    for ada in (False, True):
        out = jax.block_until_ready(film_block_forward(
            params, x, sigma_emb if ada else None, use_ada=ada,
            mxu_dtype=jnp.float32, channels_last=False))
        assert out.shape == (B, C_out, L_out), out.shape
        ref = _ref_film_block(params, x, sigma_emb if ada else None, use_ada=ada)
        assert jnp.allclose(out, ref, rtol=1e-4, atol=1e-4), \
            float(jnp.max(jnp.abs(out - ref)))

    # 2) default perf path (bf16 MXU operands, channels-last output, no transpose).
    out_bf = jax.block_until_ready(film_block_forward(params, x, sigma_emb, use_ada=True))
    ref_cl = jnp.transpose(_ref_film_block(params, x, sigma_emb, use_ada=True), (0, 2, 1))
    assert out_bf.shape == (B, L_out, C_out), out_bf.shape
    rel = jnp.linalg.norm(out_bf - ref_cl) / jnp.linalg.norm(ref_cl)
    assert rel < 3e-2, float(rel)

    # 3) batched-tile path (Bt > 1): exercises intra-block batch-boundary masking
    #    and per-segment FiLM scalars; f32 MXU for a tight check.
    B2, L2 = 8, 128
    kx2, ks2 = jax.random.split(jax.random.PRNGKey(1))
    x2 = jax.random.normal(kx2, (B2, C_in, L2), jnp.float32)
    sig2 = jax.random.normal(ks2, (B2, ADA_IN), jnp.float32)
    L2_out = (L2 + 2 - 4) // 4 + 1
    out2 = jax.block_until_ready(film_block_forward(
        params, x2, sig2, use_ada=True, mxu_dtype=jnp.float32))
    ref2 = jnp.transpose(_ref_film_block(params, x2, sig2, use_ada=True), (0, 2, 1))
    assert out2.shape == (B2, L2_out, C_out), out2.shape
    assert jnp.allclose(out2, ref2, rtol=1e-4, atol=1e-4), \
        float(jnp.max(jnp.abs(out2 - ref2)))

    print("KERNEL_OK")
</pallas_src>

<mosaic_0001>
module attributes {stable_mosaic.version = 11 : i64} {
  func.func @_film_block_kernel(%arg0: i32, %arg1: memref<16x32xf32, #tpu.memory_space<vmem>>, %arg2: memref<32x32xf32, #tpu.memory_space<vmem>>, %arg3: memref<1x32xf32, #tpu.memory_space<vmem>>, %arg4: memref<3x32x32xf32, #tpu.memory_space<vmem>>, %arg5: memref<1x32xf32, #tpu.memory_space<vmem>>, %arg6: memref<16x32xf32, #tpu.memory_space<vmem>>, %arg7: memref<32x32xf32, #tpu.memory_space<vmem>>) attributes {dimension_semantics = [#tpu.dimension_semantics<parallel>], iteration_bounds = array<i64: 2>, scalar_prefetch = 0 : i64, scratch_operands = 1 : i64, tpu.core_type = #tpu.core_type<tc>, window_params = [{transform_indices = @transform_0, window_bounds = array<i64: 16, 32>}, {pipeline_mode = #tpu.pipeline_mode<synchronous>, transform_indices = @transform_1, window_bounds = array<i64: 32, 32>}, {pipeline_mode = #tpu.pipeline_mode<synchronous>, transform_indices = @transform_2, window_bounds = array<i64: 1, 32>}, {pipeline_mode = #tpu.pipeline_mode<synchronous>, transform_indices = @transform_3, window_bounds = array<i64: 3, 32, 32>}, {pipeline_mode = #tpu.pipeline_mode<synchronous>, transform_indices = @transform_4, window_bounds = array<i64: 1, 32>}, {transform_indices = @transform_5, window_bounds = array<i64: 16, 32>}]} {
    %c0 = arith.constant 0 : index
    %c0_0 = arith.constant 0 : index
    %0 = vector.load %arg1[%c0, %c0_0] : memref<16x32xf32, #tpu.memory_space<vmem>>, vector<16x32xf32>
    %c0_1 = arith.constant 0 : index
    %c0_2 = arith.constant 0 : index
    %1 = vector.load %arg2[%c0_1, %c0_2] : memref<32x32xf32, #tpu.memory_space<vmem>>, vector<32x32xf32>
    %cst = arith.constant dense<0.000000e+00> : vector<16x32xf32>
    %2 = tpu.matmul %0, %1, %cst {dimension_numbers = #tpu.dot_dimension_numbers<[1], [0], [0], [1], [0, 0, 1, 1], [], []>} : vector<16x32xf32>, vector<32x32xf32>, vector<16x32xf32> -> vector<16x32xf32>
    %c0_3 = arith.constant 0 : index
    %c0_4 = arith.constant 0 : index
    %3 = vector.load %arg3[%c0_3, %c0_4] : memref<1x32xf32, #tpu.memory_space<vmem>>, vector<1x32xf32>
    %4 = vector.broadcast %3 : vector<1x32xf32> to vector<16x32xf32>
    %5 = arith.addf %2, %4 : vector<16x32xf32>
    %cst_5 = arith.constant 0.000000e+00 : f32
    %6 = vector.broadcast %cst_5 : f32 to vector<16x32xf32>
    %7 = arith.cmpf oge, %5, %6 : vector<16x32xf32>
    %cst_6 = arith.constant 2.000000e-01 : f32
    %8 = vector.broadcast %cst_6 : f32 to vector<16x32xf32>
    %9 = arith.mulf %8, %5 : vector<16x32xf32>
    %10 = arith.select %7, %5, %9 : vector<16x32xi1>, vector<16x32xf32>
    %c8 = arith.constant 8 : index
    %c0_7 = arith.constant 0 : index
    %11 = vector.load %arg7[%c8, %c0_7] : memref<32x32xf32, #tpu.memory_space<vmem>>, vector<16x32xf32>
    tpu.vector_store %arg7[%c8, %c0_7], %10 {strides = array<i32>} : memref<32x32xf32, #tpu.memory_space<vmem>>, vector<16x32xf32>,
    %12 = tpu.iota {dimensions = array<i32: 0>} : vector<16x1xi32>
    %c0_i32 = arith.constant 0 : i32
    %13 = vector.broadcast %c0_i32 : i32 to vector<16x1xi32>
    %14 = arith.cmpi eq, %12, %13 : vector<16x1xi32>
    %c15_i32 = arith.constant 15 : i32
    %15 = vector.broadcast %c15_i32 : i32 to vector<16x1xi32>
    %16 = arith.cmpi eq, %12, %15 : vector<16x1xi32>
    %c7 = arith.constant 7 : index
    %c0_8 = arith.constant 0 : index
    %17 = vector.load %arg7[%c7, %c0_8] : memref<32x32xf32, #tpu.memory_space<vmem>>, vector<16x32xf32>
    %cst_9 = arith.constant 0.000000e+00 : f32
    %18 = vector.shape_cast %14 : vector<16x1xi1> to vector<16x1xi1>
    %19 = vector.broadcast %18 : vector<16x1xi1> to vector<16x32xi1>
    %20 = vector.broadcast %cst_9 : f32 to vector<16x32xf32>
    %21 = arith.select %19, %20, %17 : vector<16x32xi1>, vector<16x32xf32>
    %c9 = arith.constant 9 : index
    %c0_10 = arith.constant 0 : index
    %22 = vector.load %arg7[%c9, %c0_10] : memref<32x32xf32, #tpu.memory_space<vmem>>, vector<16x32xf32>
    %cst_11 = arith.constant 0.000000e+00 : f32
    %23 = vector.shape_cast %16 : vector<16x1xi1> to vector<16x1xi1>
    %24 = vector.broadcast %23 : vector<16x1xi1> to vector<16x32xi1>
    %25 = vector.broadcast %cst_11 : f32 to vector<16x32xf32>
    %26 = arith.select %24, %25, %22 : vector<16x32xi1>, vector<16x32xf32>
    %c0_12 = arith.constant 0 : index
    %c0_13 = arith.constant 0 : index
    %c0_14 = arith.constant 0 : index
    %27 = vector.load %arg4[%c0_12, %c0_13, %c0_14] : memref<3x32x32xf32, #tpu.memory_space<vmem>>, vector<1x32x32xf32>
    %28 = vector.shape_cast %27 : vector<1x32x32xf32> to vector<32x32xf32>
    %cst_15 = arith.constant dense<0.000000e+00> : vector<16x32xf32>
    %29 = tpu.matmul %21, %28, %cst_15 {dimension_numbers = #tpu.dot_dimension_numbers<[1], [0], [0], [1], [0, 0, 1, 1], [], []>} : vector<16x32xf32>, vector<32x32xf32>, vector<16x32xf32> -> vector<16x32xf32>
    %c1 = arith.constant 1 : index
    %c0_16 = arith.constant 0 : index
    %c0_17 = arith.constant 0 : index
    %30 = vector.load %arg4[%c1, %c0_16, %c0_17] : memref<3x32x32xf32, #tpu.memory_space<vmem>>, vector<1x32x32xf32>
    %31 = vector.shape_cast %30 : vector<1x32x32xf32> to vector<32x32xf32>
    %cst_18 = arith.constant dense<0.000000e+00> : vector<16x32xf32>
    %32 = tpu.matmul %10, %31, %cst_18 {dimension_numbers = #tpu.dot_dimension_numbers<[1], [0], [0], [1], [0, 0, 1, 1], [], []>} : vector<16x32xf32>, vector<32x32xf32>, vector<16x32xf32> -> vector<16x32xf32>
    %33 = arith.addf %29, %32 : vector<16x32xf32>
    %c2 = arith.constant 2 : index
    %c0_19 = arith.constant 0 : index
    %c0_20 = arith.constant 0 : index
    %34 = vector.load %arg4[%c2, %c0_19, %c0_20] : memref<3x32x32xf32, #tpu.memory_space<vmem>>, vector<1x32x32xf32>
    %35 = vector.shape_cast %34 : vector<1x32x32xf32> to vector<32x32xf32>
    %cst_21 = arith.constant dense<0.000000e+00> : vector<16x32xf32>
    %36 = tpu.matmul %26, %35, %cst_21 {dimension_numbers = #tpu.dot_dimension_numbers<[1], [0], [0], [1], [0, 0, 1, 1], [], []>} : vector<16x32xf32>, vector<32x32xf32>, vector<16x32xf32> -> vector<16x32xf32>
    %37 = arith.addf %33, %36 : vector<16x32xf32>
    %c0_22 = arith.constant 0 : index
    %c0_23 = arith.constant 0 : index
    %38 = vector.load %arg5[%c0_22, %c0_23] : memref<1x32xf32, #tpu.memory_space<vmem>>, vector<1x32xf32>
    %39 = vector.broadcast %38 : vector<1x32xf32> to vector<16x32xf32>
    %40 = arith.addf %37, %39 : vector<16x32xf32>
    %cst_24 = arith.constant 0.000000e+00 : f32
    %41 = vector.broadcast %cst_24 : f32 to vector<16x32xf32>
    %42 = arith.cmpf oge, %40, %41 : vector<16x32xf32>
    %cst_25 = arith.constant 2.000000e-01 : f32
    %43 = vector.broadcast %cst_25 : f32 to vector<16x32xf32>
    %44 = arith.mulf %43, %40 : vector<16x32xf32>
    %45 = arith.select %42, %40, %44 : vector<16x32xi1>, vector<16x32xf32>
    %46 = arith.addf %10, %45 : vector<16x32xf32>
    %c0_26 = arith.constant 0 : index
    %c0_27 = arith.constant 0 : index
    %47 = vector.load %arg6[%c0_26, %c0_27] : memref<16x32xf32, #tpu.memory_space<vmem>>, vector<16x32xf32>
    tpu.vector_store %arg6[%c0_26, %c0_27], %46 {strides = array<i32>} : memref<16x32xf32, #tpu.memory_space<vmem>>, vector<16x32xf32>,
    return
  }
  func.func @transform_0(%arg0: i32) -> (i32, i32) {
    %c0_i32 = arith.constant 0 : i32
    %c0_i32_0 = arith.constant 0 : i32
    return %arg0, %c0_i32 : i32, i32
  }
  func.func @transform_1(%arg0: i32) -> (i32, i32) {
    %c0_i32 = arith.constant 0 : i32
    %c0_i32_0 = arith.constant 0 : i32
    %c0_i32_1 = arith.constant 0 : i32
    return %c0_i32, %c0_i32_0 : i32, i32
  }
  func.func @transform_2(%arg0: i32) -> (i32, i32) {
    %c0_i32 = arith.constant 0 : i32
    %c0_i32_0 = arith.constant 0 : i32
    %c0_i32_1 = arith.constant 0 : i32
    return %c0_i32, %c0_i32_0 : i32, i32
  }
  func.func @transform_3(%arg0: i32) -> (i32, i32, i32) {
    %c0_i32 = arith.constant 0 : i32
    %c0_i32_0 = arith.constant 0 : i32
    %c0_i32_1 = arith.constant 0 : i32
    %c0_i32_2 = arith.constant 0 : i32
    return %c0_i32, %c0_i32_0, %c0_i32_1 : i32, i32, i32
  }
  func.func @transform_4(%arg0: i32) -> (i32, i32) {
    %c0_i32 = arith.constant 0 : i32
    %c0_i32_0 = arith.constant 0 : i32
    %c0_i32_1 = arith.constant 0 : i32
    return %c0_i32, %c0_i32_0 : i32, i32
  }
  func.func @transform_5(%arg0: i32) -> (i32, i32) {
    %c0_i32 = arith.constant 0 : i32
    %c0_i32_0 = arith.constant 0 : i32
    return %arg0, %c0_i32 : i32, i32
  }
}

</mosaic_0001>

<bundles_post_ra>
// kernel: tpu_custom_call.1
= control target key start
LH: loop header
LB: loop body
LE: loop exit
PB: predicated region body
PF: predicated region fallthrough
CT: control target
= control target key end

     0   :  { %10 = vsyncpa [#allocation4], 0  ;;  %s1050_s0 = inlined_call_operand.hbm [shape: f32[32,32], index: 0, kind: input, shape index: {}]   ;;  %s1051_s1 = inlined_call_operand.hbm [shape: f32[32,32], index: 1, kind: input, shape index: {}]   ;;  %s1052_s2 = inlined_call_operand.vmem [shape: f32[1,32], index: 2, kind: input, shape index: {}]   ;;  %s1053_s3 = inlined_call_operand.hbm [shape: f32[3,32,32], index: 3, kind: input, shape index: {}]   ;;  %s1054_s4 = inlined_call_operand.vmem [shape: f32[1,32], index: 4, kind: input, shape index: {}]   ;;  %s1055_s5 = inlined_call_operand.hbm [shape: f32[32,32], index: 5, kind: output, shape index: {}]  }
   0x1   :  { %12 = vsyncpa [#allocation4 + $0x1], 0 }
   0x2   :  { %13 = vsyncpa [#allocation7], 0 }
   0x3   :  { %14 = vsyncpa [#allocation5], 0 }
   0x4   :  { %16 = vsyncpa [#allocation5 + $0x1], 0  ;;  %s878_s18 = smov 0   ;;  %s880_s19 = smov 0  }
   0x5   :  { %s882_s20 = smov 0   ;;  %s884_s21 = smov 0  }
   0x6 LB: > { %s899_s22 = sadd.s32 4294967295, %s840_s21   ;;  %s578_s23 = sadd.s32 4294967294, %s840_s21   ;;  %s840_s21 = sphi %s884_s21, %s1067_s21   ;;  %s836_s20 = sphi %s882_s20, %s1066_s20   ;;  %s832_s19 = sphi %s880_s19, %s1065_s19   ;;  %s828_s18 = sphi %s878_s18, %s1064_s18  }
   0x7   : > { %p42_p0 = scmp.ne.s32.totalorder %s832_s19, %s828_s18  ;;  %p43_p1 = scmp.eq.s32.totalorder %s899_s22, 0 }
   0x8   : > { %p150_p2 = scmp.eq.s32.totalorder %s899_s22, 1  ;;  %p156_p3 = scmp.eq.s32.totalorder %s578_s23, 1 }
   0x9   : > { %p908_p4 = por %p43_p1, %p42_p0  ;;  %p579_p5 = scmp.ge.s32.totalorder %s840_s21, 1 }
   0xa   : > { %p913_p6 = por %p156_p3, %p42_p0  ;;  %p163_p7 = scmp.lt.s32.totalorder %s840_s21, 3 }
   0xb   : > { %s174_s28 = sshll.u32 %s1051_s1, 4  ;;  %s842_s30 = smov [#allocation6]   ;;  %s175_s28 = int_to_ptr.hbm [resolvable:$true] %s174_s28 }
   0xc   : > { %p921_p8 = pnand %p579_p5, %p163_p7  ;;  %s176_s6 = sshll.u32 %s842_s30, 4  ;;  %s177_s6 = int_to_ptr.vmem [resolvable:$true] %s176_s6 }
   0xd   : > { %s191_s9 = sshll.u32 %s1053_s3, 4  ;;  %s1056_s10 = smov 128   ;;  %s192_s9 = int_to_ptr.hbm [resolvable:$true] %s191_s9 }
   0xe   : > { %p619_p9 = pneg %p921_p8  ;;  %s844_s11 = smov 8  }
   0xf   : > { %s845_s12 = smov [#allocation8]   ;;  %s940_s14 = sadd.s32 1, %s840_s21  }
  0x10   : > { %p620_p10 = pnand %p619_p9, %p43_p1  ;;  %s193_s13 = sshll.u32 %s845_s12, 4  ;;  %s194_s13 = int_to_ptr.vmem [resolvable:$true] %s193_s13 }
  0x11   : > { %s29_s15 = sadd.s32 1, %s836_s20  ;;  %s26_s16 = ssub.s32 %s840_s21, %s940_s14 }
  0x12   : > { %622 = dma.hbm_to_vmem [thread:$0]  (!%p620_p10), %s175_s28, 512, %s177_s6, [#allocation7], %s1056_s10, %s1056_s10, %s844_s11  }
  0x13   : > { %625 = dma.hbm_to_vmem [thread:$0]  (!%p620_p10), %s192_s9, 1536, %s194_s13, [#allocation7], %s1056_s10, %s1056_s10, %s844_s11  }
  0x14   : > { %p36_p12 = scmp.ne.s32.totalorder %s836_s20, %s832_s19  ;;  %p27_p13 = scmp.eq.s32.totalorder %s26_s16, 0 }
  0x15   : > { %p37_p0 = scmp.eq.s32.totalorder %s840_s21, 0  ;;  %p636_p5 = scmp.lt.s32.totalorder %s840_s21, 2 }
  0x16   : > { %p950_p3 = por %p150_p2, %p36_p12  ;;  %s210_s26 = sand.u32 1, %s836_s20  }
  0x17   : > { %s956_s23 = scalar_select %p27_p13, %s836_s20, %s29_s15  }
  0x18   : > { %p38_p7 = por %p37_p0, %p36_p12  ;;  %s583_s27 = sshll.u32 %s210_s26, 4 }
  0x19   : > { %s604_s28 = sshll.u32 %s840_s21, 4  ;;  %s214_s8 = scalar_lea.vmem [#allocation3], %s583_s27 }
  0x1a   : > { %s219_s7 = scalar_lea.hbm %s1050_s0, %s604_s28  ;;  %s222_s9 = sshll.u32 %s214_s8, 4  ;;  %s223_s9 = int_to_ptr.vmem [resolvable:$true] %s222_s9 }
  0x1b   : > { %s220_s12 = sshll.u32 %s219_s7, 4  ;;  %p963_p2 = pnand %p636_p5, %p38_p7  ;;  %s221_s12 = int_to_ptr.hbm [resolvable:$true] %s220_s12 }
  0x1c   : > { %s211_s15 = scalar_lea.sflag [#allocation4], %s210_s26  ;;  %s740_s16 = sshra.s32 %s221_s12, 4  ;;  %s741_s16 = int_to_ptr.hbm [resolvable:$true] %s740_s16 }
  0x1d   : > { %s742_s10 = scalar_lea.hbm %s741_s16, 16  ;;  %p744_p10 = pneg %p963_p2 }
  0x1e   : > { %p743_p9 = scmp.ne.s32.totalorder %s741_s16, %s742_s10  ;;  %s747_s30 = scalar_lea.hbm %s1050_s0, 32 }
  0x1f   : > { %p748_p0 = scmp.lt.s32.totalorder %s741_s16, %s1050_s0  ;;  %p749_p5 = scmp.lt.s32.totalorder %s747_s30, %s742_s10 }
  0x20   : > { %p745_p12 = pnand %p744_p10, %p743_p9 }
  0x21   : > { %p750_p7 = por %p749_p5, %p748_p0 }
  0x22   : > { %p746_p13 = pneg %p745_p12 }
  0x24   : > { %p751_p11 = pnand %p750_p7, %p746_p13 }
  0x26   : > { %754 = shalt.err (!%p751_p11)
}
  0x27   : > { %s1062_s26 = smov 128   ;;  %234 = sbr.rel (%p921_p8) target bundleno = 356 (0x164), region = 40 }
  0x28   : > { %629 = dma.hbm_to_vmem [thread:$0]  (!%p963_p2), %s221_s12, 256, %s223_s9, %s211_s15, %s1062_s26, %s1062_s26, %s844_s11  }
  0x29   : > { %s983_s8 = sand.u32 (!%p921_p8), 1, %s832_s19  }
  0x2a   : > { %s587_s10 = sshll.u32 (!%p921_p8), %s983_s8, 4  ;;  %s237_s16 = scalar_lea.sflag (!%p921_p8), [#allocation4], %s983_s8 }
  0x2b   : > { %s240_s28 = scalar_lea.vmem (!%p921_p8), [#allocation3], %s587_s10 }
  0x2c   : > { %815 = dma.done.wait (%p908_p4), %s237_s16, 256  }
  0x2d   : > { %817 = vsyncadd (%p908_p4), %s237_s16, 4294967040 }
  0x2e   : > { %819 = dma.done.wait (%p43_p1), [#allocation7], 2048  }
  0x2f   : > { %821 = vsyncadd (%p43_p1), [#allocation7], 4294965248  ;;  %v285_v0 = vld [vmem:[#allocation6 + $0x18] sm:$0xff]  ;;  %v284_v1 = vld [vmem:[#allocation6 + $0x10] sm:$0xff]  ;;  %vm290_vm0 = vcmask 261120   ;;  %v328_v28 = vlaneseq  ;;  %s605_s12 = sshll.u32 %s899_s22, 4 }
  0x30   : > { %309 = vmatpush.msra.mxu0 %v285_v0  ;;  %v283_v2 = vld [vmem:[#allocation6 + $0x8] sm:$0xff]  ;;  %v359_v3 = vld [vmem:[#allocation8 + $0x38] sm:$0xff]  ;;  %v282_v4 = vld [vmem:[#allocation6] sm:$0xff]  ;;  %s482_s27 = scalar_lea.hbm %s1055_s5, %s605_s12  ;;  %s277_s30 = scalar_lea.vmem [#allocation9], %s587_s10 }
  0x31   : > { %378 = vmatpush.msra.mxu1 %v359_v3  ;;  %v280_v5 = vld [vmem:[%s240_s28] sm:$0xff]  ;;  %v281_v6 = vld [vmem:[%s240_s28 + $0x8] sm:$0xff]  ;;  %v329_v29 = vshrl.u32 %v328_v28, 7  ;;  %s483_s6 = sshll.u32 %s277_s30, 4  ;;  %s485_s7 = sshll.u32 %s482_s27, 4  ;;  %s484_s6 = int_to_ptr.vmem [resolvable:$true] %s483_s6  ;;  %s486_s7 = int_to_ptr.hbm [resolvable:$true] %s485_s7 }
  0x32   : > { %310 = vmatpush.msra.mxu0 %v284_v1  ;;  %v358_v7 = vld [vmem:[#allocation8 + $0x30] sm:$0xff]  ;;  %v357_v8 = vld [vmem:[#allocation8 + $0x28] sm:$0xff]  ;;  %v356_v9 = vld [vmem:[#allocation8 + $0x20] sm:$0xff]  ;;  %s471_s22 = scalar_lea.sflag [#allocation5], %s983_s8  ;;  %s784_s26 = sshra.s32 %s486_s7, 4  ;;  %s785_s26 = int_to_ptr.hbm [resolvable:$true] %s784_s26 }
  0x33   : > { %379 = vmatpush.msra.mxu1 %v358_v7  ;;  %v354_v10 = vld [vmem:[#allocation8 + $0x18] sm:$0xff]  ;;  %v353_v11 = vld [vmem:[#allocation8 + $0x10] sm:$0xff]  ;;  %v352_v12 = vld [vmem:[#allocation8 + $0x8] sm:$0xff]  ;;  %v330_v32 = vadd.s32 8, %v329_v29  ;;  %s786_s16 = scalar_lea.hbm %s785_s26, 16  ;;  %s790_s24 = scalar_lea.hbm %s1055_s5, 32 }
  0x34   : > { %311 = vmatpush.msra.mxu0 %v283_v2  ;;  %407 = vmatpush.msra.mxu2 %v354_v10  ;;  %v351_v13 = vld [vmem:[#allocation8] sm:$0xff]  ;;  %v422_v14 = vld [vmem:[#allocation8 + $0x58] sm:$0xff]  ;;  %v421_v15 = vld [vmem:[#allocation8 + $0x50] sm:$0xff]  ;;  %p787_p1 = scmp.ne.s32.totalorder %s785_s26, %s786_s16  ;;  %p791_p11 = scmp.lt.s32.totalorder %s785_s26, %s1055_s5 }
  0x35   : > { %380 = vmatpush.msra.mxu1 %v357_v8  ;;  %441 = vmatpush.msra.mxu3 %v422_v14  ;;  %v420_v16 = vld [vmem:[#allocation8 + $0x48] sm:$0xff]  ;;  %v419_v17 = vld [vmem:[#allocation8 + $0x40] sm:$0xff]  ;;  %vm334_vm3 = vcmp.eq.s32.totalorder %v330_v32, 15  ;;  %p792_p2 = scmp.lt.s32.totalorder %s790_s24, %s786_s16 }
  0x36   : > { %312 = vmatpush.msra.mxu0 %v282_v4  ;;  %408 = vmatpush.msra.mxu2 %v353_v11  ;;  %v678_v18 = vld [vmem:[%s1052_s2] ss:$0 sm:$0xff]  ;;  %p788_p4 = pnand %p787_p1, %p950_p3 }
  0x37   : > { %591 = vmatmul.msk.f32.vlgmr.msra.gmra.mxu0 %vm290_vm0, %v280_v5  ;;  %381 = vmatpush.msra.mxu1 %v356_v9  ;;  %v679_v38 = vld [vmem:[%s1054_s4] ss:$0 sm:$0xff]  ;;  %p793_p9 = por %p792_p2, %p791_p11 }
  0x38   : > { %409 = vmatpush.msra.mxu2 %v352_v12  ;;  %442 = vmatpush.msra.mxu3 %v421_v15  ;;  %p789_p8 = pneg %p788_p4 }
  0x3a   : > { %410 = vmatpush.msra.mxu2 %v351_v13  ;;  %443 = vmatpush.msra.mxu3 %v420_v16  ;;  %p794_p10 = pnand %p793_p9, %p789_p8 }
  0x3c   : > { %444 = vmatpush.msra.mxu3 %v419_v17 }
  0x3f   : > { %592 = vmatmul.msk.f32.gmra.mxu0 %vm290_vm0, %v281_v6 }
  0xb4   : > { %v314_v19 = vpop.f32.mrf.mxu0 }
  0xb5   : > { %v315_v20 = vadd.f32 %v678_v18, %v314_v19 }
  0xb7   : > { %v322_v21 = vmul.f32 0.2, %v315_v20  ;;  %vm320_vm1 = vcmp.ge.f32.partialorder %v315_v20, 0.0 }
  0xb9   : > { %v324_v22 = vsel %vm320_vm1, %v315_v20, %v322_v21 }
  0xba   : > { %326 = vst.msk [vmem:[#allocation2 + $0x8] sm:$0xff] %vm290_vm0, %v324_v22  ;;  %593 = vmatmul.msk.f32.vlgmr.msra.gmra.mxu1 %vm290_vm0, %v324_v22 }
  0xbc   : > { %v317_v23 = vpop.f32.mrf.mxu0 }
  0xbd   : > { %v318_v24 = vadd.f32 %v678_v18, %v317_v23 }
  0xbf   : > { %v323_v25 = vmul.f32 0.2, %v318_v24  ;;  %vm321_vm2 = vcmp.ge.f32.partialorder %v318_v24, 0.0 }
  0xc1   : > { %v325_v26 = vsel %vm321_vm2, %v318_v24, %v323_v25  ;;  %v606_v27 = vld [vmem:[#allocation2 + $0x7] sm:$0xfe] }
  0xc2   : > { %327 = vst.msk [vmem:[#allocation2 + $0x10] sm:$0xff] %vm290_vm0, %v325_v26  ;;  %594 = vmatmul.msk.f32.gmra.mxu1 %vm290_vm0, %v325_v26  ;;  %595 = vmatmul.msk.f32.vlgmr.msra.gmra.mxu2 %vm290_vm0, %v606_v27 }
  0xc9   : > { %v336_v30 = vld [vmem:[#allocation2 + $0xf] sm:$0xff] }
  0xca   : > { %v343_v31 = vld [vmem:[#allocation2 + $0x9] sm:$0xff]  ;;  %596 = vmatmul.msk.f32.gmra.mxu2 %vm290_vm0, %v336_v30  ;;  %v344_v33 = vld [vmem:[#allocation2 + $0x11] sm:$0xff] }
  0xcb   : > { %597 = vmatmul.msk.f32.vlgmr.msra.gmra.mxu3 %vm290_vm0, %v343_v31  ;;  %v350_v34 = vsel %vm334_vm3, 0.0, %v344_v33 }
  0xd3   : > { %598 = vmatmul.msk.f32.gmra.mxu3 %vm290_vm0, %v350_v34 }
 0x137   : > { %v383_v36 = vpop.f32.mrf.mxu1 }
 0x13f   : > { %v386_v44 = vpop.f32.mrf.mxu1 }
 0x145   : > { %v412_v35 = vpop.f32.mrf.mxu2 }
 0x146   : > { %v413_v37 = vadd.f32 %v412_v35, %v383_v36 }
 0x14d   : > { %v415_v42 = vpop.f32.mrf.mxu2 }
 0x14e   : > { %v446_v39 = vpop.f32.mrf.mxu3  ;;  %v416_v45 = vadd.f32 %v415_v42, %v386_v44 }
 0x14f   : > { %v452_v40 = vadd.f32 %v446_v39, %v413_v37 }
 0x151   : > { %v458_v41 = vadd.f32 %v679_v38, %v452_v40 }
 0x153   : > { %vm460_vm4 = vcmp.ge.f32.partialorder %v458_v41, 0.0  ;;  %v462_v43 = vmul.f32 0.2, %v458_v41 }
 0x155   : > { %v464_v46 = vsel %vm460_vm4, %v458_v41, %v462_v43 }
 0x156   : > { %v466_v47 = vadd.f32 %v464_v46, %v324_v22  ;;  %v449_v48 = vpop.f32.mrf.mxu3 }
 0x157   : > { %v453_v49 = vadd.f32 %v449_v48, %v416_v45 }
 0x158   : > { %468 = vst.msk [vmem:[%s277_s30] sm:$0xff] %vm290_vm0, %v466_v47 }
 0x159   : > { %v459_v50 = vadd.f32 %v679_v38, %v453_v49 }
 0x15b   : > { %vm461_vm5 = vcmp.ge.f32.partialorder %v459_v50, 0.0  ;;  %v463_v51 = vmul.f32 0.2, %v459_v50 }
 0x15d   : > { %v465_v52 = vsel %vm461_vm5, %v459_v50, %v463_v51 }
 0x15e   : > { %v467_v53 = vadd.f32 %v465_v52, %v325_v26 }
 0x160   : > { %469 = vst.msk [vmem:[%s277_s30 + $0x8] sm:$0xff] %vm290_vm0, %v467_v53 }
 0x161   : > { %797 = shalt.err (!%p794_p10)
}
 0x162   : > { %s846_s8 = smov 128   ;;  %s847_s9 = smov 8  }
 0x163   : > { %617 = dma.vmem_to_hbm [thread:$0]  (%p950_p3), %s484_s6, 256, %s486_s7, %s471_s22, %s846_s8, %s846_s8, %s847_s9  }
 0x164 PF: > { %s500_s12 = sand.u32 1, %s828_s18   ;;  %p1063_p12 = scmp.ge.s32.totalorder %s840_s21, 2 }
 0x165   : > { %s501_s13 = scalar_lea.sflag [#allocation5], %s500_s12 }
 0x166   : > { %p631_p13 = pnand %p1063_p12, %p913_p6 }
 0x168   : > { %p632_p0 = pneg %p631_p13 }
 0x16a   : > { %823 = dma.done.wait (%p632_p0), %s501_s13, 256  }
 0x16b   : > { %825 = vsyncadd (%p632_p0), %s501_s13, 4294967040  ;;  %p19_p5 = scmp.ge.s32.totalorder %s940_s14, 4   ;;  %s1064_s18 = smov %s832_s19 }
 0x16c   : > { %s1065_s19 = smov %s836_s20  ;;  %s1066_s20 = smov %s956_s23 }
 0x16d   : > { %s1067_s21 = smov %s940_s14  ;;  %21 = sbr.rel (!%p19_p5) target bundleno = 6 (0x6), region = 95 }
 0x172   :  { %507 = vsyncpa [#allocation4], 1 }
 0x173   :  { %509 = vsyncpa [#allocation4 + $0x1], 1 }
 0x174   :  { %510 = vsyncpa [#allocation7], 1 }
 0x175   :  { %511 = vsyncpa [#allocation5], 1 }
 0x176   :  { %513 = vsyncpa [#allocation5 + $0x1], 1 }

</bundles_post_ra>
